<compile_context>
chip_gen: v7x
topology: tpu7x:2x2x1
jax: 0.10.0
libtpu: 0.0.40
codegen_flags: <defaults>
</compile_context>

<pallas_src>
import numpy as np
import jax
import jax.numpy as jnp
from jax.experimental import pallas as pl
from jax.experimental.pallas import tpu as pltpu

LANES = 128
HIDDEN = 10  # linear1 out_features


def _ceil(a, b):
    return -(-a // b)


def _make_static_sign_kernel(signs, compute_dtype):
    """Kernel for statically-known sign(v[j]) (inference; weights concrete)."""

    def kernel(x_ref, w_ref, b_ref, c_ref, o_ref):
        x = x_ref[...]                                        # (br, 128) compute_dtype
        acc = jnp.full(x.shape, c_ref[0], jnp.float32)        # folded bias, f32 acc
        # Fully unrolled over the 10 hidden units; 4 VALU ops per unit.
        for j, pos in enumerate(signs):
            w = w_ref[j].astype(compute_dtype)
            b = b_ref[j].astype(compute_dtype)
            z = x * w + b
            z = jnp.maximum(z, 0.0) if pos else jnp.minimum(z, 0.0)
            acc = acc + z.astype(jnp.float32)
        o_ref[...] = acc.astype(o_ref.dtype)

    return kernel


def _make_runtime_sign_kernel(compute_dtype):
    """Fallback when weights are traced (sign of v resolved at runtime)."""

    def kernel(x_ref, w_ref, b_ref, vpos_ref, c_ref, o_ref):
        x = x_ref[...]
        acc = jnp.full(x.shape, c_ref[0], jnp.float32)
        for j in range(HIDDEN):
            w = w_ref[j].astype(compute_dtype)
            b = b_ref[j].astype(compute_dtype)
            z = x * w + b
            zc = jnp.where(vpos_ref[j] > 0,
                           jnp.maximum(z, 0.0), jnp.minimum(z, 0.0))
            acc = acc + zc.astype(jnp.float32)
        o_ref[...] = acc.astype(o_ref.dtype)

    return kernel


def mynet_forward(x, params, *, block_rows=2048, compute_dtype=jnp.float32):
    """x: (N, 1) float32.  params dict (PyTorch-equivalent, weights stored
    pre-transposed as (in, out) so y = x @ W + b):
       w1 (1,10), b1 (1,10), w2 (10,5), b2 (1,5), w3 (5,1), b3 (1,1)

    compute_dtype=jnp.bfloat16 is a v6e/v7x lever (bf16 VALU + half HBM read);
    keep the default f32 on v5e."""
    N = x.shape[0]

    # --- constant-fold linear2 ∘ linear3 (exact up to fp32 re-association) ---
    v = (params["w2"] @ params["w3"]).reshape(HIDDEN)                   # (10,)
    c = (params["b2"] @ params["w3"] + params["b3"]).reshape(1)
    c = c.astype(jnp.float32)                                           # (1,)
    w1 = params["w1"].reshape(HIDDEN)
    b1 = params["b1"].reshape(HIDDEN)

    # --- pre-fold v into the first layer (saves one mul per hidden unit) ---
    w1v = (w1 * v).astype(jnp.float32)                                  # (10,)
    b1v = (b1 * v).astype(jnp.float32)                                  # (10,)

    try:
        signs = tuple(bool(s) for s in np.asarray(v >= 0))
    except (jax.errors.ConcretizationTypeError,
            jax.errors.TracerArrayConversionError):
        signs = None  # weights are traced -> runtime sign select

    # --- lane-dense layout: (N,1) -> (R, 128) slab ----------------------------
    rows_needed = max(_ceil(N, LANES), 1)
    rows8 = 8 * _ceil(rows_needed, 8)                 # sublane multiple
    br = min(block_rows, rows8)
    if rows8 >= 16:                                   # >=2 grid steps -> both v7x TCs
        br = min(br, 8 * _ceil(_ceil(rows8, 2), 8))
    br = max(8, (br // 8) * 8)
    num_blocks = _ceil(rows8, br)
    R = num_blocks * br
    pad = R * LANES - N

    x_flat = x.reshape(-1)
    if pad:
        # Ragged tail only; when N % 128 == 0 (and fits the block grid) the
        # reshape below is metadata-only -> no extra HBM round trip.
        x_flat = jnp.pad(x_flat, (0, pad))
    x_slab = x_flat.reshape(R, LANES).astype(compute_dtype)

    smem = pl.BlockSpec(memory_space=pltpu.MemorySpace.SMEM)
    if signs is not None:
        kernel = _make_static_sign_kernel(signs, compute_dtype)
        scalar_args = (w1v, b1v, c)
    else:
        kernel = _make_runtime_sign_kernel(compute_dtype)
        scalar_args = (w1v, b1v, (v >= 0).astype(jnp.int32), c)

    out_slab = pl.pallas_call(
        kernel,
        out_shape=jax.ShapeDtypeStruct((R, LANES), jnp.float32),
        grid_spec=pltpu.PrefetchScalarGridSpec(
            num_scalar_prefetch=0,
            grid=(num_blocks,),
            in_specs=[pl.BlockSpec((br, LANES), lambda i: (i, 0))]  # streamed x
                     + [smem] * len(scalar_args),                    # SMEM scalars
            out_specs=pl.BlockSpec((br, LANES), lambda i: (i, 0)),
        ),
        compiler_params=pltpu.CompilerParams(
            dimension_semantics=("parallel",)),
    )(x_slab, *scalar_args)

    out_flat = out_slab.reshape(-1)
    if pad:
        out_flat = out_flat[:N]      # tail slice only for the ragged case
    return out_flat.reshape(N, 1)


def init_params(key):
    """Mimics nn.Linear default init: U(-1/sqrt(fan_in), 1/sqrt(fan_in)),
    with weights stored pre-transposed as (in_features, out_features)."""
    def linear(key, fan_in, fan_out):
        kw, kb = jax.random.split(key)
        bound = 1.0 / jnp.sqrt(float(fan_in))
        w = jax.random.uniform(kw, (fan_in, fan_out), jnp.float32, -bound, bound)
        b = jax.random.uniform(kb, (1, fan_out), jnp.float32, -bound, bound)
        return w, b

    k1, k2, k3 = jax.random.split(key, 3)
    w1, b1 = linear(k1, 1, 10)
    w2, b2 = linear(k2, 10, 5)
    w3, b3 = linear(k3, 5, 1)
    return {"w1": w1, "b1": b1, "w2": w2, "b2": b2, "w3": w3, "b3": b3}


def mynet_reference(x, p):
    """Unfolded 3-matmul reference, matches the PyTorch forward exactly."""
    h = jnp.maximum(x @ p["w1"] + p["b1"], 0.0)
    h = h @ p["w2"] + p["b2"]
    return h @ p["w3"] + p["b3"]


if __name__ == "__main__":
    key = jax.random.PRNGKey(0)
    kp, kx1, kx2 = jax.random.split(key, 3)
    params = init_params(kp)

    # (1) lane-aligned batch (N % 128 == 0): no pad, no output slice; the
    #     wrapper reshapes are metadata-only.  Inputs mirror the module's
    #     training data (scalars in [0.1, 40.0], shape (N, 1)).
    N1 = 1024
    x1 = jax.random.uniform(kx1, (N1, 1), jnp.float32, 0.1, 40.0)
    out1 = jax.block_until_ready(mynet_forward(x1, params))
    ref1 = mynet_reference(x1, params)
    assert out1.shape == (N1, 1)
    # folding (w2@w3, w1*v) re-associates fp32 -> modest tolerance
    assert jnp.allclose(out1, ref1, atol=1e-3, rtol=1e-3), (out1, ref1)

    # (2) ragged batch: exercises the pad + tail-slice path.
    N2 = 37
    x2 = jax.random.uniform(kx2, (N2, 1), jnp.float32, 0.1, 40.0)
    out2 = jax.block_until_ready(mynet_forward(x2, params))
    ref2 = mynet_reference(x2, params)
    assert out2.shape == (N2, 1)
    assert jnp.allclose(out2, ref2, atol=1e-3, rtol=1e-3), (out2, ref2)

    # (3) bf16 compute variant (v6e/v7x lever; not recommended on v5e).
    #     bf16 keeps ~3 significant digits, so the tolerance is loose.
    out3 = jax.block_until_ready(
        mynet_forward(x1, params, compute_dtype=jnp.bfloat16))
    assert out3.shape == (N1, 1)
    assert jnp.allclose(out3, ref1, atol=2.0, rtol=5e-2)

    print("KERNEL_OK")
</pallas_src>

<mosaic_0001>
module attributes {stable_mosaic.version = 11 : i64} {
  func.func @kernel(%arg0: i32, %arg1: memref<8x128xf32, #tpu.memory_space<vmem>>, %arg2: memref<10xf32, #tpu.memory_space<smem>>, %arg3: memref<10xf32, #tpu.memory_space<smem>>, %arg4: memref<1xf32, #tpu.memory_space<smem>>, %arg5: memref<8x128xf32, #tpu.memory_space<vmem>>) attributes {dimension_semantics = [#tpu.dimension_semantics<parallel>], iteration_bounds = array<i64: 1>, scalar_prefetch = 0 : i64, scratch_operands = 0 : i64, tpu.core_type = #tpu.core_type<tc>, window_params = [{transform_indices = @transform_0, window_bounds = array<i64: 8, 128>}, {transform_indices = @transform_1, window_bounds = array<i64: 10>}, {transform_indices = @transform_2, window_bounds = array<i64: 10>}, {transform_indices = @transform_3, window_bounds = array<i64: 1>}, {transform_indices = @transform_4, window_bounds = array<i64: 8, 128>}]} {
    %c0 = arith.constant 0 : index
    %c0_0 = arith.constant 0 : index
    %0 = vector.load %arg1[%c0, %c0_0] : memref<8x128xf32, #tpu.memory_space<vmem>>, vector<8x128xf32>
    %c0_1 = arith.constant 0 : index
    %1 = memref.load %arg4[%c0_1] : memref<1xf32, #tpu.memory_space<smem>>
    %2 = vector.broadcast %1 : f32 to vector<8x128xf32>
    %c0_2 = arith.constant 0 : index
    %3 = memref.load %arg2[%c0_2] : memref<10xf32, #tpu.memory_space<smem>>
    %c0_3 = arith.constant 0 : index
    %4 = memref.load %arg3[%c0_3] : memref<10xf32, #tpu.memory_space<smem>>
    %5 = vector.broadcast %3 : f32 to vector<8x128xf32>
    %6 = arith.mulf %0, %5 : vector<8x128xf32>
    %7 = vector.broadcast %4 : f32 to vector<8x128xf32>
    %8 = arith.addf %6, %7 : vector<8x128xf32>
    %cst = arith.constant 0.000000e+00 : f32
    %9 = vector.broadcast %cst : f32 to vector<8x128xf32>
    %10 = arith.maximumf %8, %9 : vector<8x128xf32>
    %11 = arith.addf %2, %10 : vector<8x128xf32>
    %c1 = arith.constant 1 : index
    %12 = memref.load %arg2[%c1] : memref<10xf32, #tpu.memory_space<smem>>
    %c1_4 = arith.constant 1 : index
    %13 = memref.load %arg3[%c1_4] : memref<10xf32, #tpu.memory_space<smem>>
    %14 = vector.broadcast %12 : f32 to vector<8x128xf32>
    %15 = arith.mulf %0, %14 : vector<8x128xf32>
    %16 = vector.broadcast %13 : f32 to vector<8x128xf32>
    %17 = arith.addf %15, %16 : vector<8x128xf32>
    %cst_5 = arith.constant 0.000000e+00 : f32
    %18 = vector.broadcast %cst_5 : f32 to vector<8x128xf32>
    %19 = arith.maximumf %17, %18 : vector<8x128xf32>
    %20 = arith.addf %11, %19 : vector<8x128xf32>
    %c2 = arith.constant 2 : index
    %21 = memref.load %arg2[%c2] : memref<10xf32, #tpu.memory_space<smem>>
    %c2_6 = arith.constant 2 : index
    %22 = memref.load %arg3[%c2_6] : memref<10xf32, #tpu.memory_space<smem>>
    %23 = vector.broadcast %21 : f32 to vector<8x128xf32>
    %24 = arith.mulf %0, %23 : vector<8x128xf32>
    %25 = vector.broadcast %22 : f32 to vector<8x128xf32>
    %26 = arith.addf %24, %25 : vector<8x128xf32>
    %cst_7 = arith.constant 0.000000e+00 : f32
    %27 = vector.broadcast %cst_7 : f32 to vector<8x128xf32>
    %28 = arith.maximumf %26, %27 : vector<8x128xf32>
    %29 = arith.addf %20, %28 : vector<8x128xf32>
    %c3 = arith.constant 3 : index
    %30 = memref.load %arg2[%c3] : memref<10xf32, #tpu.memory_space<smem>>
    %c3_8 = arith.constant 3 : index
    %31 = memref.load %arg3[%c3_8] : memref<10xf32, #tpu.memory_space<smem>>
    %32 = vector.broadcast %30 : f32 to vector<8x128xf32>
    %33 = arith.mulf %0, %32 : vector<8x128xf32>
    %34 = vector.broadcast %31 : f32 to vector<8x128xf32>
    %35 = arith.addf %33, %34 : vector<8x128xf32>
    %cst_9 = arith.constant 0.000000e+00 : f32
    %36 = vector.broadcast %cst_9 : f32 to vector<8x128xf32>
    %37 = arith.minimumf %35, %36 : vector<8x128xf32>
    %38 = arith.addf %29, %37 : vector<8x128xf32>
    %c4 = arith.constant 4 : index
    %39 = memref.load %arg2[%c4] : memref<10xf32, #tpu.memory_space<smem>>
    %c4_10 = arith.constant 4 : index
    %40 = memref.load %arg3[%c4_10] : memref<10xf32, #tpu.memory_space<smem>>
    %41 = vector.broadcast %39 : f32 to vector<8x128xf32>
    %42 = arith.mulf %0, %41 : vector<8x128xf32>
    %43 = vector.broadcast %40 : f32 to vector<8x128xf32>
    %44 = arith.addf %42, %43 : vector<8x128xf32>
    %cst_11 = arith.constant 0.000000e+00 : f32
    %45 = vector.broadcast %cst_11 : f32 to vector<8x128xf32>
    %46 = arith.maximumf %44, %45 : vector<8x128xf32>
    %47 = arith.addf %38, %46 : vector<8x128xf32>
    %c5 = arith.constant 5 : index
    %48 = memref.load %arg2[%c5] : memref<10xf32, #tpu.memory_space<smem>>
    %c5_12 = arith.constant 5 : index
    %49 = memref.load %arg3[%c5_12] : memref<10xf32, #tpu.memory_space<smem>>
    %50 = vector.broadcast %48 : f32 to vector<8x128xf32>
    %51 = arith.mulf %0, %50 : vector<8x128xf32>
    %52 = vector.broadcast %49 : f32 to vector<8x128xf32>
    %53 = arith.addf %51, %52 : vector<8x128xf32>
    %cst_13 = arith.constant 0.000000e+00 : f32
    %54 = vector.broadcast %cst_13 : f32 to vector<8x128xf32>
    %55 = arith.maximumf %53, %54 : vector<8x128xf32>
    %56 = arith.addf %47, %55 : vector<8x128xf32>
    %c6 = arith.constant 6 : index
    %57 = memref.load %arg2[%c6] : memref<10xf32, #tpu.memory_space<smem>>
    %c6_14 = arith.constant 6 : index
    %58 = memref.load %arg3[%c6_14] : memref<10xf32, #tpu.memory_space<smem>>
    %59 = vector.broadcast %57 : f32 to vector<8x128xf32>
    %60 = arith.mulf %0, %59 : vector<8x128xf32>
    %61 = vector.broadcast %58 : f32 to vector<8x128xf32>
    %62 = arith.addf %60, %61 : vector<8x128xf32>
    %cst_15 = arith.constant 0.000000e+00 : f32
    %63 = vector.broadcast %cst_15 : f32 to vector<8x128xf32>
    %64 = arith.maximumf %62, %63 : vector<8x128xf32>
    %65 = arith.addf %56, %64 : vector<8x128xf32>
    %c7 = arith.constant 7 : index
    %66 = memref.load %arg2[%c7] : memref<10xf32, #tpu.memory_space<smem>>
    %c7_16 = arith.constant 7 : index
    %67 = memref.load %arg3[%c7_16] : memref<10xf32, #tpu.memory_space<smem>>
    %68 = vector.broadcast %66 : f32 to vector<8x128xf32>
    %69 = arith.mulf %0, %68 : vector<8x128xf32>
    %70 = vector.broadcast %67 : f32 to vector<8x128xf32>
    %71 = arith.addf %69, %70 : vector<8x128xf32>
    %cst_17 = arith.constant 0.000000e+00 : f32
    %72 = vector.broadcast %cst_17 : f32 to vector<8x128xf32>
    %73 = arith.maximumf %71, %72 : vector<8x128xf32>
    %74 = arith.addf %65, %73 : vector<8x128xf32>
    %c8 = arith.constant 8 : index
    %75 = memref.load %arg2[%c8] : memref<10xf32, #tpu.memory_space<smem>>
    %c8_18 = arith.constant 8 : index
    %76 = memref.load %arg3[%c8_18] : memref<10xf32, #tpu.memory_space<smem>>
    %77 = vector.broadcast %75 : f32 to vector<8x128xf32>
    %78 = arith.mulf %0, %77 : vector<8x128xf32>
    %79 = vector.broadcast %76 : f32 to vector<8x128xf32>
    %80 = arith.addf %78, %79 : vector<8x128xf32>
    %cst_19 = arith.constant 0.000000e+00 : f32
    %81 = vector.broadcast %cst_19 : f32 to vector<8x128xf32>
    %82 = arith.minimumf %80, %81 : vector<8x128xf32>
    %83 = arith.addf %74, %82 : vector<8x128xf32>
    %c9 = arith.constant 9 : index
    %84 = memref.load %arg2[%c9] : memref<10xf32, #tpu.memory_space<smem>>
    %c9_20 = arith.constant 9 : index
    %85 = memref.load %arg3[%c9_20] : memref<10xf32, #tpu.memory_space<smem>>
    %86 = vector.broadcast %84 : f32 to vector<8x128xf32>
    %87 = arith.mulf %0, %86 : vector<8x128xf32>
    %88 = vector.broadcast %85 : f32 to vector<8x128xf32>
    %89 = arith.addf %87, %88 : vector<8x128xf32>
    %cst_21 = arith.constant 0.000000e+00 : f32
    %90 = vector.broadcast %cst_21 : f32 to vector<8x128xf32>
    %91 = arith.minimumf %89, %90 : vector<8x128xf32>
    %92 = arith.addf %83, %91 : vector<8x128xf32>
    %c0_22 = arith.constant 0 : index
    %c0_23 = arith.constant 0 : index
    %93 = vector.load %arg5[%c0_22, %c0_23] : memref<8x128xf32, #tpu.memory_space<vmem>>, vector<8x128xf32>
    tpu.vector_store %arg5[%c0_22, %c0_23], %92 {strides = array<i32>} : memref<8x128xf32, #tpu.memory_space<vmem>>, vector<8x128xf32>,
    return
  }
  func.func @transform_0(%arg0: i32) -> (i32, i32) {
    %c0_i32 = arith.constant 0 : i32
    %c0_i32_0 = arith.constant 0 : i32
    return %arg0, %c0_i32 : i32, i32
  }
  func.func @transform_1(%arg0: i32) -> i32 {
    %c0_i32 = arith.constant 0 : i32
    %c0_i32_0 = arith.constant 0 : i32
    return %c0_i32 : i32
  }
  func.func @transform_2(%arg0: i32) -> i32 {
    %c0_i32 = arith.constant 0 : i32
    %c0_i32_0 = arith.constant 0 : i32
    return %c0_i32 : i32
  }
  func.func @transform_3(%arg0: i32) -> i32 {
    %c0_i32 = arith.constant 0 : i32
    %c0_i32_0 = arith.constant 0 : i32
    return %c0_i32 : i32
  }
  func.func @transform_4(%arg0: i32) -> (i32, i32) {
    %c0_i32 = arith.constant 0 : i32
    %c0_i32_0 = arith.constant 0 : i32
    return %arg0, %c0_i32 : i32, i32
  }
}

</mosaic_0001>

<bundles_post_ra>
// kernel: tpu_custom_call.1
= control target key start
LH: loop header
LB: loop body
LE: loop exit
PB: predicated region body
PF: predicated region fallthrough
CT: control target
= control target key end

     0   :  { %10 = vsyncpa [#allocation4], 0  ;;  %s353_s0 = inlined_call_operand.hbm [shape: f32[8,128], index: 0, kind: input, shape index: {}]   ;;  %s354_s1 = inlined_call_operand.vmem [shape: f32[10], index: 1, kind: input, shape index: {}]   ;;  %s355_s2 = inlined_call_operand.vmem [shape: f32[10], index: 2, kind: input, shape index: {}]   ;;  %s356_s3 = inlined_call_operand.<no memory space> [shape: f32[1], index: 3, kind: input, shape index: {}]   ;;  %s357_s4 = inlined_call_operand.hbm [shape: f32[8,128], index: 4, kind: output, shape index: {}]  }
   0x1   :  { %11 = vsyncpa [#allocation6], 0 }
   0x2   :  { %12 = vsyncpa [#allocation9], 0 }
   0x3   :  { %13 = vsyncpa [#allocation5], 0  ;;  %s30_s17 = sshll.u32 %s354_s1, 4  ;;  %s255_s18 = smov [#allocation3]   ;;  %s31_s17 = int_to_ptr.vmem [resolvable:$true] %s30_s17 }
   0x4   :  { %s20_s19 = sshll.u32 %s255_s18, 4  ;;  %s179_s22 = scalar_lea.hbm %s353_s0, 128  ;;  %s21_s19 = int_to_ptr.vmem [resolvable:$true] %s20_s19 }
   0x5   :  { %p180_p0 = scmp.ne.s32.totalorder %s353_s0, %s179_s22  ;;  %p183_p1 = scmp.lt.u32.totalorder %s179_s22, %s353_s0 }
   0x7   :  { %p185_p2 = pnand %p183_p1, %p180_p0 }
   0x9   :  { %188 = shalt.err (!%p185_p2)
}
   0xa   :  { %s189_s27 = scalar_lea.vmem %s21_s19, 128  ;;  %p194_p4 = scmp.lt.s32.totalorder %s21_s19, %s21_s19 }
   0xb   :  { %p190_p3 = scmp.ne.s32.totalorder %s21_s19, %s189_s27  ;;  %p195_p5 = scmp.lt.s32.totalorder %s189_s27, %s189_s27 }
   0xd   :  { %p196_p6 = por %p195_p5, %p194_p4 }
   0xf   :  { %p197_p7 = pnand %p196_p6, %p190_p3 }
  0x11   :  { %200 = shalt.err (!%p197_p7)
}
  0x12   :  { %23 = dma.hbm_to_vmem [thread:$0]  %s353_s0, 128, %s21_s19, [#allocation4]  }
  0x13   :  { %s201_s29 = scalar_lea.vmem %s31_s17, 16  ;;  %p206_p9 = scmp.lt.s32.totalorder %s31_s17, %s31_s17 }
  0x14   :  { %p202_p8 = scmp.ne.s32.totalorder %s31_s17, %s201_s29  ;;  %p207_p10 = scmp.lt.s32.totalorder %s201_s29, %s201_s29 }
  0x16   :  { %p208_p11 = por %p207_p10, %p206_p9 }
  0x18   :  { %p209_p12 = pnand %p208_p11, %p202_p8 }
  0x1a   :  { %212 = shalt.err (!%p209_p12)
}
  0x1b   :  { %s256_s30 = smov [#allocation7]   ;;  %s40_s7 = sshll.u32 %s355_s2, 4  ;;  %s41_s7 = int_to_ptr.vmem [resolvable:$true] %s40_s7 }
  0x1c   :  { %33 = dma.vmem_to_smem %s31_s17, 16, %s256_s30, [#allocation6]  }
  0x1d   :  { %s213_s8 = scalar_lea.vmem %s41_s7, 16  ;;  %p218_p0 = scmp.lt.s32.totalorder %s41_s7, %s41_s7 }
  0x1e   :  { %p214_p13 = scmp.ne.s32.totalorder %s41_s7, %s213_s8  ;;  %p219_p1 = scmp.lt.s32.totalorder %s213_s8, %s213_s8 }
  0x20   :  { %p220_p2 = por %p219_p1, %p218_p0 }
  0x22   :  { %p221_p3 = pnand %p220_p2, %p214_p13 }
  0x24   :  { %224 = shalt.err (!%p221_p3)
}
  0x25   :  { %s257_s0 = smov [#allocation8]  }
  0x26   :  { %43 = dma.vmem_to_smem %s41_s7, 16, %s257_s0, [#allocation9]  }
  0x27   :  { %247 = dma.done.wait [#allocation4], 128  }
  0x28   :  { %248 = vsyncadd [#allocation4], 4294967168 }
  0x29   :  { %249 = dma.done.wait [#allocation6], 16  }
  0x2a   :  { %250 = vsyncadd [#allocation6], 4294967280 }
  0x2b   :  { %251 = dma.done.wait [#allocation9], 16  }
  0x2c   :  { %252 = vsyncadd [#allocation9], 4294967280 }
  0x2d   :  { %55 = sfence }
  0x2e   :  { %s59_s9 = sld [smem:[#allocation7]]  ;;  %s157_s2 = sld [smem:[#allocation7 + $0x1]]  ;;  %v56_v0 = vld [vmem:[#allocation3] sm:$0xff]  ;;  %v58_v6 = vstv %s356_s3 }
  0x2f   :  { %s60_s10 = sld [smem:[#allocation8]]  ;;  %s158_s11 = sld [smem:[#allocation8 + $0x1]] }
  0x30   :  { %s159_s12 = sld [smem:[#allocation7 + $0x2]]  ;;  %s161_s14 = sld [smem:[#allocation7 + $0x3]] }
  0x31   :  { %s302_s13 = sld [smem:[#allocation8 + $0x2]]  ;;  %s304_s15 = sld [smem:[#allocation8 + $0x3]] }
  0x32   :  { %s163_s16 = sld [smem:[#allocation7 + $0x4]]  ;;  %s308_s18 = sld [smem:[#allocation7 + $0x5]] }
  0x33   :  { %s306_s17 = sld [smem:[#allocation8 + $0x4]]  ;;  %s310_s19 = sld [smem:[#allocation8 + $0x5]] }
  0x34   :  { %v61_v1 = vstv %s59_s9  ;;  %s312_s20 = sld [smem:[#allocation7 + $0x6]]  ;;  %v69_v4 = vstv %s157_s2  ;;  %s316_s22 = sld [smem:[#allocation7 + $0x7]] }
  0x35   :  { %v63_v2 = vstv %s60_s10  ;;  %s314_s21 = sld [smem:[#allocation8 + $0x6]]  ;;  %v62_v3 = vmul.f32 %v61_v1, %v56_v0  ;;  %v71_v5 = vstv %s158_s11  ;;  %v70_v7 = vmul.f32 %v69_v4, %v56_v0  ;;  %s322_s25 = sld [smem:[#allocation8 + $0x7]] }
  0x36   :  { %v77_v8 = vstv %s159_s12  ;;  %s324_s26 = sld [smem:[#allocation7 + $0x8]]  ;;  %v85_v12 = vstv %s161_s14  ;;  %s327_s27 = sld [smem:[#allocation7 + $0x9]] }
  0x37   :  { %v79_v9 = vstv %s302_s13  ;;  %v64_v10 = vadd.f32 %v63_v2, %v62_v3  ;;  %v78_v11 = vmul.f32 %v77_v8, %v56_v0  ;;  %v87_v13 = vstv %s304_s15  ;;  %s330_s3 = sld [smem:[#allocation8 + $0x8]]  ;;  %s174_s1 = sld [smem:[#allocation8 + $0x9]] }
  0x38   :  { %v72_v14 = vadd.f32 %v71_v5, %v70_v7  ;;  %v86_v15 = vmul.f32 %v85_v12, %v56_v0  ;;  %v93_v16 = vstv %s163_s16  ;;  %v101_v21 = vstv %s308_s18  ;;  %s258_s28 = smov [#allocation10]  }
  0x39   :  { %v95_v17 = vstv %s306_s17  ;;  %v65_v18 = vmax.f32 %v64_v10, 0.0  ;;  %v80_v19 = vadd.f32 %v79_v9, %v78_v11  ;;  %v94_v20 = vmul.f32 %v93_v16, %v56_v0  ;;  %s146_s29 = sshll.u32 %s258_s28, 4  ;;  %s147_s29 = int_to_ptr.vmem [resolvable:$true] %s146_s29 }
  0x3a   :  { %v73_v22 = vmax.f32 %v72_v14, 0.0  ;;  %v88_v23 = vadd.f32 %v87_v13, %v86_v15  ;;  %v102_v24 = vmul.f32 %v101_v21, %v56_v0  ;;  %v103_v25 = vstv %s310_s19  ;;  %s225_s30 = scalar_lea.vmem %s147_s29, 128  ;;  %p230_p5 = scmp.lt.s32.totalorder %s147_s29, %s147_s29 }
  0x3b   :  { %v66_v26 = vadd.f32 %v65_v18, %v58_v6  ;;  %v81_v27 = vmax.f32 %v80_v19, 0.0  ;;  %v96_v28 = vadd.f32 %v95_v17, %v94_v20  ;;  %v109_v29 = vstv %s312_s20  ;;  %p226_p4 = scmp.ne.s32.totalorder %s147_s29, %s225_s30  ;;  %p231_p6 = scmp.lt.s32.totalorder %s225_s30, %s225_s30 }
  0x3c   :  { %v110_v30 = vmul.f32 %v109_v29, %v56_v0  ;;  %v111_v31 = vstv %s314_s21  ;;  %v89_v33 = vmin.f32 %v88_v23, 0.0  ;;  %v104_v34 = vadd.f32 %v103_v25, %v102_v24 }
  0x3d   :  { %v74_v32 = vadd.f32 %v73_v22, %v66_v26  ;;  %v117_v35 = vstv %s316_s22  ;;  %v97_v36 = vmax.f32 %v96_v28, 0.0  ;;  %v119_v38 = vstv %s322_s25  ;;  %p232_p7 = por %p231_p6, %p230_p5 }
  0x3e   :  { %v118_v37 = vmul.f32 %v117_v35, %v56_v0  ;;  %v125_v39 = vstv %s324_s26  ;;  %v112_v41 = vadd.f32 %v111_v31, %v110_v30  ;;  %v133_v43 = vstv %s327_s27 }
  0x3f   :  { %v82_v40 = vadd.f32 %v81_v27, %v74_v32  ;;  %v126_v42 = vmul.f32 %v125_v39, %v56_v0  ;;  %v127_v44 = vstv %s330_s3  ;;  %v105_v46 = vmax.f32 %v104_v34, 0.0  ;;  %p233_p8 = pnand %p232_p7, %p226_p4 }
  0x40   :  { %v120_v47 = vadd.f32 %v119_v38, %v118_v37  ;;  %v134_v48 = vmul.f32 %v133_v43, %v56_v0  ;;  %v135_v49 = vstv %s174_s1  ;;  %v113_v51 = vmax.f32 %v112_v41, 0.0 }
  0x41   :  { %v90_v45 = vadd.f32 %v89_v33, %v82_v40  ;;  %v128_v52 = vadd.f32 %v127_v44, %v126_v42 }
  0x42   :  { %v121_v54 = vmax.f32 %v120_v47, 0.0  ;;  %v136_v55 = vadd.f32 %v135_v49, %v134_v48 }
  0x43   :  { %v98_v50 = vadd.f32 %v97_v36, %v90_v45  ;;  %v129_v57 = vmin.f32 %v128_v52, 0.0 }
  0x44   :  { %v137_v59 = vmin.f32 %v136_v55, 0.0 }
  0x45   :  { %v106_v53 = vadd.f32 %v105_v46, %v98_v50 }
  0x47   :  { %v114_v56 = vadd.f32 %v113_v51, %v106_v53 }
  0x49   :  { %v122_v58 = vadd.f32 %v121_v54, %v114_v56 }
  0x4b   :  { %v130_v60 = vadd.f32 %v129_v57, %v122_v58 }
  0x4d   :  { %v138_v61 = vadd.f32 %v137_v59, %v130_v60 }
  0x4f   :  { %139 = vst [vmem:[#allocation10] sm:$0xff] %v138_v61 }
  0x50   :  { %236 = shalt.err (!%p233_p8)
}
  0x51   :  { %s237_s7 = scalar_lea.hbm %s357_s4, 128 }
  0x52   :  { %p238_p9 = scmp.ne.s32.totalorder %s357_s4, %s237_s7  ;;  %p241_p10 = scmp.lt.u32.totalorder %s237_s7, %s357_s4 }
  0x54   :  { %p243_p11 = pnand %p241_p10, %p238_p9 }
  0x56   :  { %246 = shalt.err (!%p243_p11)
}
  0x57   :  { %149 = dma.vmem_to_hbm [thread:$0]  %s147_s29, 128, %s357_s4, [#allocation5]  }
  0x58   :  { %253 = dma.done.wait [#allocation5], 128  }
  0x59   :  { %254 = vsyncadd [#allocation5], 4294967168 }
  0x5a   :  { %153 = vsyncpa [#allocation4], 1 }
  0x5b   :  { %154 = vsyncpa [#allocation5], 1 }
  0x5c   :  { %155 = vsyncpa [#allocation6], 1 }
  0x5d   :  { %156 = vsyncpa [#allocation9], 1 }

</bundles_post_ra>
